<compile_context>
chip_gen: v5e
topology: v5e:2x2
jax: 0.10.0
libtpu: 0.0.40
codegen_flags: <defaults>
</compile_context>

<pallas_src>
import jax
import jax.numpy as jnp
from jax.experimental import pallas as pl
from jax.experimental.pallas import tpu as pltpu

_LANES = 128
_SUBLANES = 8
_MAX_TILE_ROWS = 2048          # 2048 rows * 128 lanes * 4 B = 1 MiB per f32 block


def _sampler_kernel(mu_ref, logvar_ref, eps_ref, out_ref):
    # Purely elementwise: eps * exp(0.5 * logvar) + mu, computed in f32.
    lv = logvar_ref[...].astype(jnp.float32)
    std = jnp.exp(lv * 0.5)                        # EUP
    mu = mu_ref[...].astype(jnp.float32)
    eps = eps_ref[...]                             # already f32
    out_ref[...] = (eps * std + mu).astype(out_ref.dtype)


def vae_sample(mu, logvar, seed=0):
    """eps.mul(std).add_(mu) with std = logvar.mul(0.5).exp_()."""
    assert mu.shape == logvar.shape and mu.dtype == logvar.dtype
    orig_shape = mu.shape
    n = mu.size
    itemsize = jnp.dtype(mu.dtype).itemsize

    # Flatten to a lane-dense (rows, 128) slab; pad only if needed.
    pad = (-n) % (_SUBLANES * _LANES)
    mu_flat = mu.reshape(-1)
    lv_flat = logvar.reshape(-1)
    if pad:
        mu_flat = jnp.pad(mu_flat, (0, pad))
        lv_flat = jnp.pad(lv_flat, (0, pad))
    rows = (n + pad) // _LANES
    mu_2d = mu_flat.reshape(rows, _LANES)
    lv_2d = lv_flat.reshape(rows, _LANES)

    # eps ~ N(0,1) in float32, deterministic w.r.t. `seed`.
    # TODO(synk): on a pure-TPU path this could use pltpu.prng_seed +
    # pltpu.stateful_normal in-kernel to avoid the extra eps HBM stream.
    eps_2d = jax.random.normal(jax.random.PRNGKey(seed), (rows, _LANES),
                               dtype=jnp.float32)

    # Tile rows: ~1 MiB per f32 block, partial last block handled by Pallas.
    tile_r = min(_MAX_TILE_ROWS, rows)
    grid = (pl.cdiv(rows, tile_r),)

    block_spec = pl.BlockSpec((tile_r, _LANES), lambda i: (i, 0))
    block_bytes = tile_r * _LANES * 4
    # 4 arrays x 2 buffers x block + margin, floored at 32 MiB (safe on all chips).
    vmem_bytes = max(32 * 1024 * 1024, 4 * 2 * block_bytes + 2 * 1024 * 1024)

    cost = pl.CostEstimate(
        flops=3 * n,                 # mul, fma
        transcendentals=n,           # exp
        bytes_accessed=n * (3 * itemsize + 4),   # mu + logvar + out, eps in f32
    )

    out_2d = pl.pallas_call(
        _sampler_kernel,
        out_shape=jax.ShapeDtypeStruct((rows, _LANES), mu.dtype),
        grid=grid,
        in_specs=[block_spec, block_spec, block_spec],
        out_specs=block_spec,
        compiler_params=pltpu.CompilerParams(
            dimension_semantics=("parallel",),
            vmem_limit_bytes=vmem_bytes,
        ),
        cost_estimate=cost,
    )(mu_2d, lv_2d, eps_2d)

    if pad:
        return out_2d.reshape(-1)[:n].reshape(orig_shape)
    return out_2d.reshape(orig_shape)


if __name__ == "__main__":
    key = jax.random.PRNGKey(0)
    k_mu, k_lv = jax.random.split(key)

    # Small latent-style NCHW shapes (batch=2, nz=4, spatial=16x16).
    B, C, H, W = 2, 4, 16, 16
    mu = jax.random.normal(k_mu, (B, C, H, W), dtype=jnp.float32)
    logvar = jax.random.normal(k_lv, (B, C, H, W), dtype=jnp.float32) * 0.1

    out = vae_sample(mu, logvar, seed=0)
    out = jax.block_until_ready(out)

    # Shape/dtype sanity and finiteness.
    assert out.shape == (B, C, H, W)
    assert out.dtype == jnp.float32
    assert bool(jnp.all(jnp.isfinite(out)))

    # Determinism w.r.t. seed (same seed -> same sample).
    out2 = jax.block_until_ready(vae_sample(mu, logvar, seed=0))
    assert bool(jnp.all(out == out2))

    # Numerical check against the straight-line reference (same eps).
    eps_ref = jax.random.normal(jax.random.PRNGKey(0),
                                (mu.size // 128, 128), jnp.float32)
    ref = (eps_ref.reshape(B, C, H, W) * jnp.exp(0.5 * logvar) + mu)
    assert bool(jnp.allclose(out, ref, atol=1e-5, rtol=1e-5))

    print("KERNEL_OK")
</pallas_src>

<mosaic_0001>
module attributes {stable_mosaic.version = 11 : i64} {
  func.func @_sampler_kernel(%arg0: i32, %arg1: memref<16x128xf32, #tpu.memory_space<vmem>>, %arg2: memref<16x128xf32, #tpu.memory_space<vmem>>, %arg3: memref<16x128xf32, #tpu.memory_space<vmem>>, %arg4: memref<16x128xf32, #tpu.memory_space<vmem>>) attributes {dimension_semantics = [#tpu.dimension_semantics<parallel>], iteration_bounds = array<i64: 1>, scalar_prefetch = 0 : i64, scratch_operands = 0 : i64, tpu.core_type = #tpu.core_type<tc>, window_params = [{transform_indices = @transform_0, window_bounds = array<i64: 16, 128>}, {transform_indices = @transform_1, window_bounds = array<i64: 16, 128>}, {transform_indices = @transform_2, window_bounds = array<i64: 16, 128>}, {transform_indices = @transform_3, window_bounds = array<i64: 16, 128>}]} {
    %c0 = arith.constant 0 : index
    %c0_0 = arith.constant 0 : index
    %0 = vector.load %arg2[%c0, %c0_0] : memref<16x128xf32, #tpu.memory_space<vmem>>, vector<16x128xf32>
    %cst = arith.constant 5.000000e-01 : f32
    %1 = vector.broadcast %cst : f32 to vector<16x128xf32>
    %2 = arith.mulf %0, %1 : vector<16x128xf32>
    %3 = math.exp %2 : vector<16x128xf32>
    %c0_1 = arith.constant 0 : index
    %c0_2 = arith.constant 0 : index
    %4 = vector.load %arg1[%c0_1, %c0_2] : memref<16x128xf32, #tpu.memory_space<vmem>>, vector<16x128xf32>
    %c0_3 = arith.constant 0 : index
    %c0_4 = arith.constant 0 : index
    %5 = vector.load %arg3[%c0_3, %c0_4] : memref<16x128xf32, #tpu.memory_space<vmem>>, vector<16x128xf32>
    %6 = arith.mulf %5, %3 : vector<16x128xf32>
    %7 = arith.addf %6, %4 : vector<16x128xf32>
    %c0_5 = arith.constant 0 : index
    %c0_6 = arith.constant 0 : index
    %8 = vector.load %arg4[%c0_5, %c0_6] : memref<16x128xf32, #tpu.memory_space<vmem>>, vector<16x128xf32>
    tpu.vector_store %arg4[%c0_5, %c0_6], %7 {strides = array<i32>} : memref<16x128xf32, #tpu.memory_space<vmem>>, vector<16x128xf32>,
    return
  }
  func.func @transform_0(%arg0: i32) -> (i32, i32) {
    %c0_i32 = arith.constant 0 : i32
    %c0_i32_0 = arith.constant 0 : i32
    return %arg0, %c0_i32 : i32, i32
  }
  func.func @transform_1(%arg0: i32) -> (i32, i32) {
    %c0_i32 = arith.constant 0 : i32
    %c0_i32_0 = arith.constant 0 : i32
    return %arg0, %c0_i32 : i32, i32
  }
  func.func @transform_2(%arg0: i32) -> (i32, i32) {
    %c0_i32 = arith.constant 0 : i32
    %c0_i32_0 = arith.constant 0 : i32
    return %arg0, %c0_i32 : i32, i32
  }
  func.func @transform_3(%arg0: i32) -> (i32, i32) {
    %c0_i32 = arith.constant 0 : i32
    %c0_i32_0 = arith.constant 0 : i32
    return %arg0, %c0_i32 : i32, i32
  }
}

</mosaic_0001>

<bundles_post_ra>
// kernel: tpu_custom_call.1
= control target key start
LH: loop header
LB: loop body
LE: loop exit
PB: predicated region body
PF: predicated region fallthrough
CT: control target
= control target key end

     0   :  { %8 = vsyncpa [#allocation3], 0  ;;  %s262_s0 = inlined_call_operand.hbm [shape: f32[16,128], index: 0, kind: input, shape index: {}]   ;;  %s263_s1 = inlined_call_operand.hbm [shape: f32[16,128], index: 1, kind: input, shape index: {}]   ;;  %s264_s2 = inlined_call_operand.hbm [shape: f32[16,128], index: 2, kind: input, shape index: {}]   ;;  %s265_s3 = inlined_call_operand.hbm [shape: f32[16,128], index: 3, kind: output, shape index: {}]  }
   0x1   :  { %9 = vsyncpa [#allocation6], 0 }
   0x2   :  { %10 = vsyncpa [#allocation4], 0  ;;  %s28_s14 = sshll.u32 %s263_s1, 4  ;;  %s212_s15 = smov [#allocation5]   ;;  %s29_s14 = int_to_ptr.hbm [resolvable:$true] %s28_s14 }
   0x3   :  { %s30_s16 = sshll.u32 %s212_s15, 4  ;;  %s15_s19 = sshll.u32 %s262_s0, 4  ;;  %s31_s16 = int_to_ptr.vmem [resolvable:$true] %s30_s16  ;;  %s16_s19 = int_to_ptr.hbm [resolvable:$true] %s15_s19 }
   0x4   :  { %s213_s20 = smov 128   ;;  %s214_s21 = smov 8  }
   0x5   :  { %36 = dma.hbm_to_vmem [thread:$0]  %s29_s14, 256, %s31_s16, [#allocation6], %s213_s20, %s213_s20, %s214_s21  }
   0x6   :  { %s215_s22 = smov [#allocation2]   ;;  %s41_s1 = sshll.u32 %s264_s2, 4  ;;  %s42_s1 = int_to_ptr.hbm [resolvable:$true] %s41_s1 }
   0x7   :  { %s17_s23 = sshll.u32 %s215_s22, 4  ;;  %s216_s0 = smov [#allocation7]   ;;  %s18_s23 = int_to_ptr.vmem [resolvable:$true] %s17_s23 }
   0x8   :  { %23 = dma.hbm_to_vmem [thread:$0]  %s16_s19, 256, %s18_s23, [#allocation3], %s213_s20, %s213_s20, %s214_s21  }
   0x9   :  { %s43_s26 = sshll.u32 %s216_s0, 4  ;;  %s44_s26 = int_to_ptr.vmem [resolvable:$true] %s43_s26 }
   0xa   :  { %49 = dma.hbm_to_vmem [thread:$0]  %s42_s1, 256, %s44_s26, [#allocation6], %s213_s20, %s213_s20, %s214_s21  }
   0xb   :  { %206 = dma.done.wait [#allocation3], 256  }
   0xc   :  { %207 = vsyncadd [#allocation3], 4294967040 }
   0xd   :  { %208 = dma.done.wait [#allocation6], 512  }
   0xe   :  { %209 = vsyncadd [#allocation6], 4294966784  ;;  %v62_v0 = vld [vmem:[#allocation5] sm:$0xff]  ;;  %v63_v2 = vld [vmem:[#allocation5 + $0x8] sm:$0xff]  ;;  %s217_s2 = smov [#allocation8]   ;;  %s86_s30 = sshll.u32 %s265_s3, 4  ;;  %s87_s30 = int_to_ptr.hbm [resolvable:$true] %s86_s30 }
   0xf   :  { %v64_v1 = vmul.f32 0.5, %v62_v0  ;;  %v65_v3 = vmul.f32 0.5, %v63_v2  ;;  %v72_v6 = vld [vmem:[#allocation7] sm:$0xff]  ;;  %v73_v7 = vld [vmem:[#allocation7 + $0x8] sm:$0xff]  ;;  %s84_s27 = sshll.u32 %s217_s2, 4  ;;  %s85_s27 = int_to_ptr.vmem [resolvable:$true] %s84_s27 }
  0x10   :  { %v70_v9 = vld [vmem:[#allocation2] sm:$0xff]  ;;  %v71_v12 = vld [vmem:[#allocation2 + $0x8] sm:$0xff] }
  0x11   :  { %v66_v4 = vmul.f32 1.442695, %v64_v1  ;;  %v68_v5 = vmul.f32 1.442695, %v65_v3 }
  0x13   :  { %106 = vpow2.f32 %v66_v4 }
  0x14   :  { %108 = vpow2.f32 %v68_v5 }
  0x19   :  { %v107_v8 = vpop.eup %106 }
  0x1a   :  { %v109_v10 = vpop.eup %108  ;;  %v74_v11 = vmul.f32 %v107_v8, %v72_v6 }
  0x1b   :  { %v75_v13 = vmul.f32 %v109_v10, %v73_v7 }
  0x1c   :  { %v76_v14 = vadd.f32 %v74_v11, %v70_v9 }
  0x1d   :  { %v77_v15 = vadd.f32 %v75_v13, %v71_v12 }
  0x1e   :  { %78 = vst [vmem:[#allocation8] sm:$0xff] %v76_v14 }
  0x1f   :  { %79 = vst [vmem:[#allocation8 + $0x8] sm:$0xff] %v77_v15 }
  0x20   :  { %92 = dma.vmem_to_hbm [thread:$0]  %s85_s27, 256, %s87_s30, [#allocation4], %s213_s20, %s213_s20, %s214_s21  }
  0x21   :  { %210 = dma.done.wait [#allocation4], 256  }
  0x22   :  { %211 = vsyncadd [#allocation4], 4294967040 }
  0x23   :  { %97 = vsyncpa [#allocation3], 1 }
  0x24   :  { %98 = vsyncpa [#allocation6], 1 }
  0x25   :  { %99 = vsyncpa [#allocation4], 1 }

</bundles_post_ra>
